<compile_context>
chip_gen: v5e
topology: v5e:2x2
jax: 0.10.0
libtpu: 0.0.40
codegen_flags: <defaults>
</compile_context>

<pallas_src>
import functools

import numpy as np
import jax
import jax.numpy as jnp
from jax.experimental import pallas as pl
from jax.experimental.pallas import tpu as pltpu


def _round_up(v, m):
    return ((v + m - 1) // m) * m


def _fused_attr_kernel(x_ref, w_ref, b_ref, mask_ref, o_ref, *, num_heads):
    """One row-tile: fused linear over all heads + per-head (segment) softmax.

    x_ref:    (TN, D_pad)           row tile of ROI features
    w_ref:    (D_pad, A_pad)        all head weights, concatenated + padded
    b_ref:    (1, A_pad)            all head biases, concatenated + padded
    mask_ref: (H, A_pad)            per-head column masks (1.0 / 0.0)
    o_ref:    (TN, A_pad)           per-head softmax probabilities (padded)
    """
    logits = jnp.dot(
        x_ref[...], w_ref[...], preferred_element_type=jnp.float32
    ) + b_ref[...]                                        # (TN, A_pad) f32

    masks = mask_ref[...]                                 # (H, A_pad) {0,1}
    valid = jnp.sum(masks, axis=0, keepdims=True)         # (1, A_pad)
    neg_big = jnp.float32(-1e30)

    # Per-segment (per attribute head) max, broadcast back onto its columns.
    col_max = jnp.zeros_like(logits)
    for h in range(num_heads):                            # H is small & static
        m_h = masks[h:h + 1, :]                           # (1, A_pad)
        seg_max = jnp.max(jnp.where(m_h > 0, logits, neg_big),
                          axis=-1, keepdims=True)         # (TN, 1)
        col_max = col_max + m_h * seg_max                 # heads are disjoint

    # Numerically-stable exp; padded lanes forced to 0 so they never leak.
    e = jnp.where(valid > 0, jnp.exp(logits - col_max), 0.0)

    # Per-segment denominator, broadcast back onto its columns.
    col_denom = jnp.zeros_like(logits)
    for h in range(num_heads):
        m_h = masks[h:h + 1, :]
        seg_sum = jnp.sum(e * m_h, axis=-1, keepdims=True)  # (TN, 1)
        col_denom = col_denom + m_h * seg_sum
    col_denom = jnp.where(valid > 0, col_denom, 1.0)      # avoid 1/0 on padding

    o_ref[...] = (e * pl.reciprocal(col_denom, approx=True)).astype(o_ref.dtype)


def fused_attribute_probs(x, w_cat, b_cat, head_sizes, *, row_tile=128,
                          matmul_dtype=None):
    """softmax-per-head(x @ W_cat + b_cat) in a single fused Pallas call.

    x:       (N, D)            ROI features
    w_cat:   (D, sum A_i)      pre-transposed, concatenated head weights
    b_cat:   (1, sum A_i)      concatenated head biases
    returns  (N, sum A_i)      concatenated per-head softmax probabilities
    """
    n, d = x.shape
    a_total = int(w_cat.shape[1])
    num_heads = len(head_sizes)

    # MXU / lane friendly padding.
    d_pad = _round_up(d, 128)
    a_pad = _round_up(a_total, 128)
    tn = min(row_tile, _round_up(n, 8))      # ragged-safe row tile
    n_pad = _round_up(n, tn)

    x_p = jnp.pad(x, ((0, n_pad - n), (0, d_pad - d)))
    w_p = jnp.pad(w_cat, ((0, d_pad - d), (0, a_pad - a_total)))
    b_p = jnp.pad(b_cat, ((0, 0), (0, a_pad - a_total))).astype(jnp.float32)

    if matmul_dtype is not None:             # e.g. jnp.bfloat16 on v6e / v7x
        x_p = x_p.astype(matmul_dtype)
        w_p = w_p.astype(matmul_dtype)

    # Per-head column masks over the padded class axis (built host-side once).
    masks_np = np.zeros((num_heads, a_pad), dtype=np.float32)
    off = 0
    for h, a_i in enumerate(head_sizes):
        masks_np[h, off:off + a_i] = 1.0
        off += a_i
    masks = jnp.asarray(masks_np)

    grid = (n_pad // tn,)
    out = pl.pallas_call(
        functools.partial(_fused_attr_kernel, num_heads=num_heads),
        out_shape=jax.ShapeDtypeStruct((n_pad, a_pad), x.dtype),
        grid_spec=pltpu.PrefetchScalarGridSpec(
            num_scalar_prefetch=0,
            grid=grid,
            in_specs=[
                pl.BlockSpec((tn, d_pad), lambda i: (i, 0)),        # x rows
                pl.BlockSpec((d_pad, a_pad), lambda i: (0, 0)),     # W resident
                pl.BlockSpec((1, a_pad), lambda i: (0, 0)),         # bias
                pl.BlockSpec((num_heads, a_pad), lambda i: (0, 0)), # masks
            ],
            out_specs=pl.BlockSpec((tn, a_pad), lambda i: (i, 0)),
        ),
        compiler_params=pltpu.CompilerParams(
            dimension_semantics=("parallel",),   # shard row tiles across TCs
        ),
    )(x_p, w_p, b_p, masks)

    return out[:n, :a_total]


class AttributeOutputLayersPallas:
    """JAX/Pallas mirror of AttributeOutputLayers (inference path)."""

    def __init__(self, input_size, mapped_ids_list, key, loss_weight=1.0):
        self.mapped_ids_list = mapped_ids_list
        self.loss_weight = loss_weight
        self.head_sizes = [len(m) for m in mapped_ids_list]

        self.weights = []   # list of (D, A_i)   (pre-transposed nn.Linear weight)
        self.biases = []    # list of (1, A_i)
        for a_i in self.head_sizes:
            key, sub = jax.random.split(key)
            # nn.init.normal_(weight, std=0.01); bias = 0
            w = 0.01 * jax.random.normal(sub, (input_size, a_i), dtype=jnp.float32)
            b = jnp.zeros((1, a_i), dtype=jnp.float32)
            self.weights.append(w)
            self.biases.append(b)

        # Fused parameters for the single-kernel path.
        self.w_cat = jnp.concatenate(self.weights, axis=1)   # (D, sum A_i)
        self.b_cat = jnp.concatenate(self.biases, axis=1)    # (1, sum A_i)
        offs = np.cumsum([0] + self.head_sizes)
        self.head_offsets = [(int(offs[i]), int(offs[i + 1]))
                             for i in range(len(self.head_sizes))]

    def merged_probs(self, x, matmul_dtype=None):
        """(N, sum A_i) concatenated per-head softmax probabilities."""
        return fused_attribute_probs(x, self.w_cat, self.b_cat, self.head_sizes,
                                     matmul_dtype=matmul_dtype)

    def forward(self, x, num_boxes_per_image):
        """Eval-mode forward: per-image attribute_probs (attribute_inference)."""
        merged = self.merged_probs(x)                         # (N, sum A_i)
        out, start = [], 0
        for n_b in num_boxes_per_image:
            out.append(merged[start:start + n_b])
            start += n_b
        return out


def _reference(x, weights, biases, num_boxes_per_image):
    probs = []
    for w, b in zip(weights, biases):
        logits = x @ w + b
        probs.append(jax.nn.softmax(logits, axis=1))
    merged = jnp.concatenate(probs, axis=1)
    out, start = [], 0
    for n_b in num_boxes_per_image:
        out.append(merged[start:start + n_b])
        start += n_b
    return out


if __name__ == "__main__":
    key = jax.random.PRNGKey(0)

    # Small, module-consistent shapes:
    #   input_size (flattened ROI feature dim) = 32
    #   8 proposal boxes total, split across 2 images as [5, 3]
    #   3 attribute types with 4 / 6 / 3 classes each
    input_size = 32
    num_boxes_per_image = [5, 3]
    n_total = sum(num_boxes_per_image)
    mapped_ids_list = [list(range(4)), list(range(6)), list(range(3))]

    key, kx, kp = jax.random.split(key, 3)
    x = jax.random.normal(kx, (n_total, input_size), dtype=jnp.float32)

    module = AttributeOutputLayersPallas(input_size, mapped_ids_list, kp)

    out = module.forward(x, num_boxes_per_image)
    out = [jax.block_until_ready(o) for o in out]

    ref = _reference(x, module.weights, module.biases, num_boxes_per_image)
    for o, r in zip(out, ref):
        assert o.shape == r.shape
        # approx reciprocal (~1e-3 rel. error) -> loosened tolerance.
        assert jnp.max(jnp.abs(o - r)) < 5e-3

    print("KERNEL_OK")
</pallas_src>

<mosaic_0001>
module attributes {stable_mosaic.version = 11 : i64} {
  func.func @_fused_attr_kernel(%arg0: i32, %arg1: memref<8x128xf32, #tpu.memory_space<vmem>>, %arg2: memref<128x128xf32, #tpu.memory_space<vmem>>, %arg3: memref<1x128xf32, #tpu.memory_space<vmem>>, %arg4: memref<3x128xf32, #tpu.memory_space<vmem>>, %arg5: memref<8x128xf32, #tpu.memory_space<vmem>>) attributes {dimension_semantics = [#tpu.dimension_semantics<parallel>], iteration_bounds = array<i64: 1>, scalar_prefetch = 0 : i64, scratch_operands = 0 : i64, tpu.core_type = #tpu.core_type<tc>, window_params = [{transform_indices = @transform_0, window_bounds = array<i64: 8, 128>}, {pipeline_mode = #tpu.pipeline_mode<synchronous>, transform_indices = @transform_1, window_bounds = array<i64: 128, 128>}, {pipeline_mode = #tpu.pipeline_mode<synchronous>, transform_indices = @transform_2, window_bounds = array<i64: 1, 128>}, {pipeline_mode = #tpu.pipeline_mode<synchronous>, transform_indices = @transform_3, window_bounds = array<i64: 3, 128>}, {transform_indices = @transform_4, window_bounds = array<i64: 8, 128>}]} {
    %c0 = arith.constant 0 : index
    %c0_0 = arith.constant 0 : index
    %0 = vector.load %arg1[%c0, %c0_0] : memref<8x128xf32, #tpu.memory_space<vmem>>, vector<8x128xf32>
    %c0_1 = arith.constant 0 : index
    %c0_2 = arith.constant 0 : index
    %1 = vector.load %arg2[%c0_1, %c0_2] : memref<128x128xf32, #tpu.memory_space<vmem>>, vector<128x128xf32>
    %cst = arith.constant dense<0.000000e+00> : vector<8x128xf32>
    %2 = tpu.matmul %0, %1, %cst {dimension_numbers = #tpu.dot_dimension_numbers<[1], [0], [0], [1], [0, 0, 1, 1], [], []>} : vector<8x128xf32>, vector<128x128xf32>, vector<8x128xf32> -> vector<8x128xf32>
    %c0_3 = arith.constant 0 : index
    %c0_4 = arith.constant 0 : index
    %3 = vector.load %arg3[%c0_3, %c0_4] : memref<1x128xf32, #tpu.memory_space<vmem>>, vector<1x128xf32>
    %4 = vector.broadcast %3 : vector<1x128xf32> to vector<8x128xf32>
    %5 = arith.addf %2, %4 : vector<8x128xf32>
    %c0_5 = arith.constant 0 : index
    %c0_6 = arith.constant 0 : index
    %6 = vector.load %arg4[%c0_5, %c0_6] : memref<3x128xf32, #tpu.memory_space<vmem>>, vector<3x128xf32>
    %cst_7 = arith.constant dense<0.000000e+00> : vector<128xf32>
    %7 = vector.multi_reduction <add>, %6, %cst_7 [0] : vector<3x128xf32> to vector<128xf32>
    %8 = vector.shape_cast %7 : vector<128xf32> to vector<1x128xf32>
    %cst_8 = arith.constant 0.000000e+00 : f32
    %9 = vector.broadcast %cst_8 : f32 to vector<8x128xf32>
    %10 = vector.extract_strided_slice %6 {offsets = [0, 0], sizes = [1, 128], strides = [1, 1]} : vector<3x128xf32> to vector<1x128xf32>
    %cst_9 = arith.constant 0.000000e+00 : f32
    %11 = vector.broadcast %cst_9 : f32 to vector<1x128xf32>
    %12 = arith.cmpf ogt, %10, %11 : vector<1x128xf32>
    %cst_10 = arith.constant -1.000000e+30 : f32
    %13 = vector.shape_cast %12 : vector<1x128xi1> to vector<1x128xi1>
    %14 = vector.broadcast %13 : vector<1x128xi1> to vector<8x128xi1>
    %15 = vector.broadcast %cst_10 : f32 to vector<8x128xf32>
    %16 = arith.select %14, %5, %15 : vector<8x128xi1>, vector<8x128xf32>
    %cst_11 = arith.constant dense<0xFF800000> : vector<8xf32>
    %17 = vector.multi_reduction <maximumf>, %16, %cst_11 [1] : vector<8x128xf32> to vector<8xf32>
    %18 = vector.shape_cast %17 : vector<8xf32> to vector<8x1xf32>
    %19 = vector.broadcast %10 : vector<1x128xf32> to vector<8x128xf32>
    %20 = vector.broadcast %18 : vector<8x1xf32> to vector<8x128xf32>
    %21 = arith.mulf %19, %20 : vector<8x128xf32>
    %22 = arith.addf %9, %21 : vector<8x128xf32>
    %23 = vector.extract_strided_slice %6 {offsets = [1, 0], sizes = [1, 128], strides = [1, 1]} : vector<3x128xf32> to vector<1x128xf32>
    %cst_12 = arith.constant 0.000000e+00 : f32
    %24 = vector.broadcast %cst_12 : f32 to vector<1x128xf32>
    %25 = arith.cmpf ogt, %23, %24 : vector<1x128xf32>
    %cst_13 = arith.constant -1.000000e+30 : f32
    %26 = vector.shape_cast %25 : vector<1x128xi1> to vector<1x128xi1>
    %27 = vector.broadcast %26 : vector<1x128xi1> to vector<8x128xi1>
    %28 = vector.broadcast %cst_13 : f32 to vector<8x128xf32>
    %29 = arith.select %27, %5, %28 : vector<8x128xi1>, vector<8x128xf32>
    %cst_14 = arith.constant dense<0xFF800000> : vector<8xf32>
    %30 = vector.multi_reduction <maximumf>, %29, %cst_14 [1] : vector<8x128xf32> to vector<8xf32>
    %31 = vector.shape_cast %30 : vector<8xf32> to vector<8x1xf32>
    %32 = vector.broadcast %23 : vector<1x128xf32> to vector<8x128xf32>
    %33 = vector.broadcast %31 : vector<8x1xf32> to vector<8x128xf32>
    %34 = arith.mulf %32, %33 : vector<8x128xf32>
    %35 = arith.addf %22, %34 : vector<8x128xf32>
    %36 = vector.extract_strided_slice %6 {offsets = [2, 0], sizes = [1, 128], strides = [1, 1]} : vector<3x128xf32> to vector<1x128xf32>
    %cst_15 = arith.constant 0.000000e+00 : f32
    %37 = vector.broadcast %cst_15 : f32 to vector<1x128xf32>
    %38 = arith.cmpf ogt, %36, %37 : vector<1x128xf32>
    %cst_16 = arith.constant -1.000000e+30 : f32
    %39 = vector.shape_cast %38 : vector<1x128xi1> to vector<1x128xi1>
    %40 = vector.broadcast %39 : vector<1x128xi1> to vector<8x128xi1>
    %41 = vector.broadcast %cst_16 : f32 to vector<8x128xf32>
    %42 = arith.select %40, %5, %41 : vector<8x128xi1>, vector<8x128xf32>
    %cst_17 = arith.constant dense<0xFF800000> : vector<8xf32>
    %43 = vector.multi_reduction <maximumf>, %42, %cst_17 [1] : vector<8x128xf32> to vector<8xf32>
    %44 = vector.shape_cast %43 : vector<8xf32> to vector<8x1xf32>
    %45 = vector.broadcast %36 : vector<1x128xf32> to vector<8x128xf32>
    %46 = vector.broadcast %44 : vector<8x1xf32> to vector<8x128xf32>
    %47 = arith.mulf %45, %46 : vector<8x128xf32>
    %48 = arith.addf %35, %47 : vector<8x128xf32>
    %cst_18 = arith.constant 0.000000e+00 : f32
    %49 = vector.broadcast %cst_18 : f32 to vector<1x128xf32>
    %50 = arith.cmpf ogt, %8, %49 : vector<1x128xf32>
    %51 = arith.subf %5, %48 : vector<8x128xf32>
    %52 = math.exp %51 : vector<8x128xf32>
    %cst_19 = arith.constant 0.000000e+00 : f32
    %53 = vector.shape_cast %50 : vector<1x128xi1> to vector<1x128xi1>
    %54 = vector.broadcast %53 : vector<1x128xi1> to vector<8x128xi1>
    %55 = vector.broadcast %cst_19 : f32 to vector<8x128xf32>
    %56 = arith.select %54, %52, %55 : vector<8x128xi1>, vector<8x128xf32>
    %cst_20 = arith.constant 0.000000e+00 : f32
    %57 = vector.broadcast %cst_20 : f32 to vector<8x128xf32>
    %58 = vector.extract_strided_slice %6 {offsets = [0, 0], sizes = [1, 128], strides = [1, 1]} : vector<3x128xf32> to vector<1x128xf32>
    %59 = vector.broadcast %58 : vector<1x128xf32> to vector<8x128xf32>
    %60 = arith.mulf %56, %59 : vector<8x128xf32>
    %cst_21 = arith.constant dense<0.000000e+00> : vector<8xf32>
    %61 = vector.multi_reduction <add>, %60, %cst_21 [1] : vector<8x128xf32> to vector<8xf32>
    %62 = vector.shape_cast %61 : vector<8xf32> to vector<8x1xf32>
    %63 = vector.broadcast %58 : vector<1x128xf32> to vector<8x128xf32>
    %64 = vector.broadcast %62 : vector<8x1xf32> to vector<8x128xf32>
    %65 = arith.mulf %63, %64 : vector<8x128xf32>
    %66 = arith.addf %57, %65 : vector<8x128xf32>
    %67 = vector.extract_strided_slice %6 {offsets = [1, 0], sizes = [1, 128], strides = [1, 1]} : vector<3x128xf32> to vector<1x128xf32>
    %68 = vector.broadcast %67 : vector<1x128xf32> to vector<8x128xf32>
    %69 = arith.mulf %56, %68 : vector<8x128xf32>
    %cst_22 = arith.constant dense<0.000000e+00> : vector<8xf32>
    %70 = vector.multi_reduction <add>, %69, %cst_22 [1] : vector<8x128xf32> to vector<8xf32>
    %71 = vector.shape_cast %70 : vector<8xf32> to vector<8x1xf32>
    %72 = vector.broadcast %67 : vector<1x128xf32> to vector<8x128xf32>
    %73 = vector.broadcast %71 : vector<8x1xf32> to vector<8x128xf32>
    %74 = arith.mulf %72, %73 : vector<8x128xf32>
    %75 = arith.addf %66, %74 : vector<8x128xf32>
    %76 = vector.extract_strided_slice %6 {offsets = [2, 0], sizes = [1, 128], strides = [1, 1]} : vector<3x128xf32> to vector<1x128xf32>
    %77 = vector.broadcast %76 : vector<1x128xf32> to vector<8x128xf32>
    %78 = arith.mulf %56, %77 : vector<8x128xf32>
    %cst_23 = arith.constant dense<0.000000e+00> : vector<8xf32>
    %79 = vector.multi_reduction <add>, %78, %cst_23 [1] : vector<8x128xf32> to vector<8xf32>
    %80 = vector.shape_cast %79 : vector<8xf32> to vector<8x1xf32>
    %81 = vector.broadcast %76 : vector<1x128xf32> to vector<8x128xf32>
    %82 = vector.broadcast %80 : vector<8x1xf32> to vector<8x128xf32>
    %83 = arith.mulf %81, %82 : vector<8x128xf32>
    %84 = arith.addf %75, %83 : vector<8x128xf32>
    %cst_24 = arith.constant 0.000000e+00 : f32
    %85 = vector.broadcast %cst_24 : f32 to vector<1x128xf32>
    %86 = arith.cmpf ogt, %8, %85 : vector<1x128xf32>
    %cst_25 = arith.constant 1.000000e+00 : f32
    %87 = vector.shape_cast %86 : vector<1x128xi1> to vector<1x128xi1>
    %88 = vector.broadcast %87 : vector<1x128xi1> to vector<8x128xi1>
    %89 = vector.broadcast %cst_25 : f32 to vector<8x128xf32>
    %90 = arith.select %88, %84, %89 : vector<8x128xi1>, vector<8x128xf32>
    %91 = tpu.reciprocal %90 {approx = true} : vector<8x128xf32> -> vector<8x128xf32>
    %92 = arith.mulf %56, %91 : vector<8x128xf32>
    %c0_26 = arith.constant 0 : index
    %c0_27 = arith.constant 0 : index
    %93 = vector.load %arg5[%c0_26, %c0_27] : memref<8x128xf32, #tpu.memory_space<vmem>>, vector<8x128xf32>
    tpu.vector_store %arg5[%c0_26, %c0_27], %92 {strides = array<i32>} : memref<8x128xf32, #tpu.memory_space<vmem>>, vector<8x128xf32>,
    return
  }
  func.func @transform_0(%arg0: i32) -> (i32, i32) {
    %c0_i32 = arith.constant 0 : i32
    %c0_i32_0 = arith.constant 0 : i32
    return %arg0, %c0_i32 : i32, i32
  }
  func.func @transform_1(%arg0: i32) -> (i32, i32) {
    %c0_i32 = arith.constant 0 : i32
    %c0_i32_0 = arith.constant 0 : i32
    %c0_i32_1 = arith.constant 0 : i32
    return %c0_i32, %c0_i32_0 : i32, i32
  }
  func.func @transform_2(%arg0: i32) -> (i32, i32) {
    %c0_i32 = arith.constant 0 : i32
    %c0_i32_0 = arith.constant 0 : i32
    %c0_i32_1 = arith.constant 0 : i32
    return %c0_i32, %c0_i32_0 : i32, i32
  }
  func.func @transform_3(%arg0: i32) -> (i32, i32) {
    %c0_i32 = arith.constant 0 : i32
    %c0_i32_0 = arith.constant 0 : i32
    %c0_i32_1 = arith.constant 0 : i32
    return %c0_i32, %c0_i32_0 : i32, i32
  }
  func.func @transform_4(%arg0: i32) -> (i32, i32) {
    %c0_i32 = arith.constant 0 : i32
    %c0_i32_0 = arith.constant 0 : i32
    return %arg0, %c0_i32 : i32, i32
  }
}

</mosaic_0001>

<bundles_post_ra>
// kernel: tpu_custom_call.1
= control target key start
LH: loop header
LB: loop body
LE: loop exit
PB: predicated region body
PF: predicated region fallthrough
CT: control target
= control target key end

     0   :  { %9 = vsyncpa [#allocation3], 0  ;;  %s344_s0 = inlined_call_operand.hbm [shape: f32[8,128], index: 0, kind: input, shape index: {}]   ;;  %s345_s1 = inlined_call_operand.hbm [shape: f32[128,128], index: 1, kind: input, shape index: {}]   ;;  %s346_s2 = inlined_call_operand.vmem [shape: f32[1,128], index: 2, kind: input, shape index: {}]   ;;  %s347_s3 = inlined_call_operand.hbm [shape: f32[3,128], index: 3, kind: input, shape index: {}]   ;;  %s348_s4 = inlined_call_operand.hbm [shape: f32[8,128], index: 4, kind: output, shape index: {}]  }
   0x1   :  { %10 = vsyncpa [#allocation6], 0  ;;  %s27_s17 = sshll.u32 %s345_s1, 4  ;;  %s28_s17 = int_to_ptr.hbm [resolvable:$true] %s27_s17 }
   0x2   :  { %11 = vsyncpa [#allocation4], 0  ;;  %s295_s18 = smov [#allocation5]   ;;  %s17_s22 = sshll.u32 %s344_s0, 4  ;;  %s18_s22 = int_to_ptr.hbm [resolvable:$true] %s17_s22 }
   0x3   :  { %s29_s19 = sshll.u32 %s295_s18, 4  ;;  %s296_s23 = smov 128   ;;  %s30_s19 = int_to_ptr.vmem [resolvable:$true] %s29_s19 }
   0x4   :  { %s297_s24 = smov 8   ;;  %s298_s25 = smov [#allocation2]  }
   0x5   :  { %35 = dma.hbm_to_vmem [thread:$0]  %s28_s17, 2048, %s30_s19, [#allocation6], %s296_s23, %s296_s23, %s297_s24  }
   0x6   :  { %s19_s26 = sshll.u32 %s298_s25, 4  ;;  %s43_s29 = sshll.u32 %s347_s3, 4  ;;  %s20_s26 = int_to_ptr.vmem [resolvable:$true] %s19_s26  ;;  %s44_s29 = int_to_ptr.hbm [resolvable:$true] %s43_s29 }
   0x7   :  { %22 = dma.hbm_to_vmem [thread:$0]  %s18_s22, 128, %s20_s26, [#allocation3]  }
   0x8   :  { %s299_s1 = smov [#allocation7]  }
   0x9   :  { %s45_s30 = sshll.u32 %s299_s1, 4  ;;  %s46_s30 = int_to_ptr.vmem [resolvable:$true] %s45_s30 }
   0xa   :  { %48 = dma.hbm_to_vmem [thread:$0]  %s44_s29, 64, %s46_s30, [#allocation6]  }
   0xb   :  { %289 = dma.done.wait [#allocation3], 128  }
   0xc   :  { %290 = vsyncadd [#allocation3], 4294967168 }
   0xd   :  { %291 = dma.done.wait [#allocation6], 2112  }
   0xe   :  { %292 = vsyncadd [#allocation6], 4294965184  ;;  %v77_v0 = vld [vmem:[#allocation5 + $0x78] sm:$0xff]  ;;  %v76_v1 = vld [vmem:[#allocation5 + $0x70] sm:$0xff]  ;;  %v300_v18 = vmov 0   ;;  %vm103_vm4 = vcmask 1042432  }
   0xf   :  { %82 = vmatpush.msra.mxu0 %v77_v0  ;;  %v75_v2 = vld [vmem:[#allocation5 + $0x68] sm:$0xff]  ;;  %v74_v3 = vld [vmem:[#allocation5 + $0x60] sm:$0xff]  ;;  %v73_v4 = vld [vmem:[#allocation5 + $0x58] sm:$0xff]  ;;  %s170_s8 = sshll.u32 %s348_s4, 4  ;;  %s171_s8 = int_to_ptr.hbm [resolvable:$true] %s170_s8 }
  0x10   :  { %v72_v5 = vld [vmem:[#allocation5 + $0x50] sm:$0xff]  ;;  %v71_v6 = vld [vmem:[#allocation5 + $0x48] sm:$0xff]  ;;  %v70_v7 = vld [vmem:[#allocation5 + $0x40] sm:$0xff] }
  0x11   :  { %83 = vmatpush.msra.mxu0 %v76_v1  ;;  %v69_v8 = vld [vmem:[#allocation5 + $0x38] sm:$0xff]  ;;  %v68_v9 = vld [vmem:[#allocation5 + $0x30] sm:$0xff]  ;;  %v67_v10 = vld [vmem:[#allocation5 + $0x28] sm:$0xff] }
  0x12   :  { %v66_v11 = vld [vmem:[#allocation5 + $0x20] sm:$0xff]  ;;  %v65_v12 = vld [vmem:[#allocation5 + $0x18] sm:$0xff]  ;;  %v64_v13 = vld [vmem:[#allocation5 + $0x10] sm:$0xff] }
  0x13   :  { %84 = vmatpush.msra.mxu0 %v75_v2  ;;  %v63_v14 = vld [vmem:[#allocation5 + $0x8] sm:$0xff]  ;;  %v62_v15 = vld [vmem:[#allocation5] sm:$0xff]  ;;  %v61_v16 = vld [vmem:[#allocation2] sm:$0xff] }
  0x14   :  { %v102_v17 = vld [vmem:[#allocation7] sm:$0x7]  ;;  %v188_v22 = vld [vmem:[%s346_s2] ss:$0 sm:$0xff]  ;;  %s301_s2 = smov [#allocation8]  }
  0x15   :  { %85 = vmatpush.msra.mxu0 %v74_v3  ;;  %vm111_vm0 = vcmp.gt.f32.partialorder %v102_v17, 0.0  ;;  %v104_v29 = vsel %vm103_vm4, %v102_v17, 0.0  ;;  %v118_v33 = vperm.slane %v102_v17, 0  ;;  %v126_v34 = vperm.slane %v102_v17, 1  ;;  %s168_s5 = sshll.u32 %s301_s2, 4  ;;  %s169_s5 = int_to_ptr.vmem [resolvable:$true] %s168_s5 }
  0x16   :  { %v112_v19 = vsel %vm111_vm0, 1, %v300_v18  ;;  %v105_v30 = vrot.slane %v104_v29, 4  ;;  %v134_v35 = vperm.slane %v102_v17, 2 }
  0x17   :  { %86 = vmatpush.msra.mxu0 %v73_v4  ;;  %v129_v20 = vperm.slane %v112_v19, 2  ;;  %v113_v21 = vperm.slane %v112_v19, 0  ;;  %v121_v27 = vperm.slane %v112_v19, 1 }
  0x18   :  { %v106_v32 = vadd.f32 %v105_v30, %v104_v29 }
  0x19   :  { %87 = vmatpush.msra.mxu0 %v72_v5  ;;  %vm130_vm1 = vcmp.eq.s32.totalorder %v129_v20, 1  ;;  %vm114_vm2 = vcmp.eq.s32.totalorder %v113_v21, 1  ;;  %vm122_vm3 = vcmp.eq.s32.totalorder %v121_v27, 1 }
  0x1a   :  { %v107_v36 = vrot.slane %v106_v32, 2 }
  0x1b   :  { %88 = vmatpush.msra.mxu0 %v71_v6 }
  0x1c   :  { %v108_v43 = vadd.f32 %v107_v36, %v106_v32 }
  0x1d   :  { %89 = vmatpush.msra.mxu0 %v70_v7 }
  0x1e   :  { %v109_v46 = vrot.slane %v108_v43, 1 }
  0x1f   :  { %90 = vmatpush.msra.mxu0 %v69_v8 }
  0x20   :  { %v110_v48 = vadd.f32 %v109_v46, %v108_v43 }
  0x21   :  { %91 = vmatpush.msra.mxu0 %v68_v9 }
  0x22   :  { %vm137_vm5 = vcmp.gt.f32.partialorder %v110_v48, 0.0 }
  0x23   :  { %92 = vmatpush.msra.mxu0 %v67_v10 }
  0x25   :  { %93 = vmatpush.msra.mxu0 %v66_v11 }
  0x27   :  { %94 = vmatpush.msra.mxu0 %v65_v12 }
  0x29   :  { %95 = vmatpush.msra.mxu0 %v64_v13 }
  0x2b   :  { %96 = vmatpush.msra.mxu0 %v63_v14 }
  0x2d   :  { %97 = vmatpush.msra.mxu0 %v62_v15 }
  0x2e   :  { %98 = vmatmul.f32.vlgmr.msra.gmra.mxu0 %v61_v16 }
  0xab   :  { %v99_v23 = vpop.f32.mrf.mxu0 }
  0xac   :  { %v100_v24 = vadd.f32 %v188_v22, %v99_v23 }
  0xae   :  { %v131_v25 = vsel %vm130_vm1, %v100_v24, -1e+30  ;;  %v115_v26 = vsel %vm114_vm2, %v100_v24, -1e+30  ;;  %v123_v28 = vsel %vm122_vm3, %v100_v24, -1e+30 }
  0xaf   :  { %132 = vmax.xlane.f32.xlu1 %v131_v25  ;;  %116 = vmax.xlane.f32.xlu0 %v115_v26 }
  0xb7   :  { %124 = vmax.xlane.f32.xlu0 %v123_v28 }
 0x122   :  { %v117_v31 = vpop.xlane.xlu0 %116  ;;  %v133_v37 = vpop.xlane.xlu1 %132 }
 0x123   :  { %v119_v39 = vmul.f32 %v118_v33, %v117_v31  ;;  %v135_v41 = vmul.f32 %v134_v35, %v133_v37 }
 0x12a   :  { %v125_v38 = vpop.xlane.xlu0 %124 }
 0x12b   :  { %v127_v40 = vmul.f32 %v126_v34, %v125_v38 }
 0x12d   :  { %v128_v42 = vadd.f32 %v127_v40, %v119_v39 }
 0x12f   :  { %v136_v44 = vadd.f32 %v135_v41, %v128_v42 }
 0x131   :  { %v138_v45 = vsub.f32 %v100_v24, %v136_v44 }
 0x133   :  { %v139_v47 = vmul.f32 1.442695, %v138_v45 }
 0x135   :  { %189 = vpow2.f32 %v139_v47 }
 0x13b   :  { %v190_v49 = vpop.eup %189 }
 0x13c   :  { %v143_v50 = vsel %vm137_vm5, %v190_v49, 0.0 }
 0x13d   :  { %v149_v51 = vmul.f32 %v143_v50, %v126_v34  ;;  %v144_v52 = vmul.f32 %v143_v50, %v118_v33  ;;  %v154_v53 = vmul.f32 %v143_v50, %v134_v35 }
 0x13f   :  { %150 = vadd.xlane.f32.xlu2 %v149_v51  ;;  %145 = vadd.xlane.f32.xlu1 %v144_v52 }
 0x147   :  { %155 = vadd.xlane.f32.xlu2 %v154_v53 }
 0x1b2   :  { %v151_v54 = vpop.xlane.xlu2 %150  ;;  %v146_v55 = vpop.xlane.xlu1 %145 }
 0x1b3   :  { %v152_v56 = vmul.f32 %v151_v54, %v126_v34  ;;  %v147_v57 = vmul.f32 %v146_v55, %v118_v33 }
 0x1b5   :  { %v153_v59 = vadd.f32 %v152_v56, %v147_v57 }
 0x1ba   :  { %v156_v58 = vpop.xlane.xlu2 %155 }
 0x1bb   :  { %v157_v60 = vmul.f32 %v156_v58, %v134_v35 }
 0x1bd   :  { %v158_v61 = vadd.f32 %v157_v60, %v153_v59 }
 0x1bf   :  { %v159_v62 = vsel %vm137_vm5, %v158_v61, 1.0 }
 0x1c0   :  { %191 = vrcp.f32 %v159_v62 }
 0x1c6   :  { %v192_v63 = vpop.eup %191 }
 0x1c7   :  { %v161_v0 = vmul.f32 %v192_v63, %v143_v50 }
 0x1c9   :  { %162 = vst [vmem:[#allocation8] sm:$0xff] %v161_v0 }
 0x1ca   :  { %173 = dma.vmem_to_hbm [thread:$0]  %s169_s5, 128, %s171_s8, [#allocation4]  }
 0x1cb   :  { %293 = dma.done.wait [#allocation4], 128  }
 0x1cc   :  { %294 = vsyncadd [#allocation4], 4294967168 }
 0x1cd   :  { %178 = vsyncpa [#allocation3], 1 }
 0x1ce   :  { %179 = vsyncpa [#allocation6], 1 }
 0x1cf   :  { %180 = vsyncpa [#allocation4], 1 }

</bundles_post_ra>
